<compile_context>
chip_gen: v7x
topology: tpu7x:2x2x1
jax: 0.10.0
libtpu: 0.0.40
codegen_flags: <defaults>
</compile_context>

<pallas_src>
import functools

import jax
import jax.numpy as jnp
from jax.experimental import pallas as pl
from jax.experimental.pallas import tpu as pltpu


def _round_up(x, m):
    return ((x + m - 1) // m) * m


def _sublane(dtype):
    # 8 sublanes for 4-byte, 16 for 2-byte, 32 for 1-byte dtypes.
    return max(8, 32 // jnp.dtype(dtype).itemsize)


# ---------------------------------------------------------------------------
# Pallas kernel: lane-dense rowwise linear projection  out = x @ W_bd + b
#   x tile:   (tm, pack*K)        `pack` patch rows packed per kernel row
#   W_bd:     (pack*K, pack*Ep)   block-diagonal replication of W (VMEM resident)
#   b tile:   (1,  pack*Ep)       f32 bias, tiled `pack` times (VMEM resident)
#   out tile: (tm, pack*Ep)       128-lane dense (pack*Ep is a multiple of 128)
# ---------------------------------------------------------------------------
def _proj_kernel(x_ref, w_ref, b_ref, o_ref):
    acc = jnp.dot(x_ref[...], w_ref[...], preferred_element_type=jnp.float32)
    o_ref[...] = (acc + b_ref[...]).astype(o_ref.dtype)


def make_projection_params(w, b, *, compute_dtype=jnp.bfloat16):
    """Precompute the resident block-diagonal weight and tiled f32 bias.

    w: (in_features, embed_size), b: (embed_size,).  Built ONCE, not per call.
    """
    _, embed = w.shape
    if embed <= 128 and 128 % embed == 0:
        pack, embed_pad = 128 // embed, embed          # pack * embed == 128
    else:
        pack, embed_pad = 1, _round_up(embed, 128)     # pad columns -> lane-dense
    if embed_pad != embed:
        w = jnp.pad(w, ((0, 0), (0, embed_pad - embed)))
        b = jnp.pad(b, (0, embed_pad - embed))
    w_bd = jnp.kron(jnp.eye(pack, dtype=w.dtype), w).astype(compute_dtype)
    b2d = jnp.tile(b.astype(jnp.float32), pack).reshape(1, pack * embed_pad)
    return {"w_bd": w_bd, "b2d": b2d}


def linear_projection(rows, w_bd, b2d, embed_size, *, tm=2048, out_dtype=None):
    """rows: (N, K) -> (N, embed_size) via the precomputed block-diagonal weight."""
    N, K = rows.shape
    Kp, Ep = w_bd.shape
    assert Kp % K == 0, "block-diagonal weight does not match row length"
    pack = Kp // K
    embed_pad = Ep // pack
    compute_dtype = w_bd.dtype
    out_dtype = jnp.dtype(out_dtype if out_dtype is not None else rows.dtype)

    sub = _sublane(compute_dtype)
    align = pack * sub
    n_rows = _round_up(N, align)                 # <= pack*sub-1 extra rows only
    if n_rows != N:
        rows = jnp.pad(rows, ((0, n_rows - N), (0, 0)))
    n_packed = n_rows // pack                    # multiple of `sub`

    x2d = rows.astype(compute_dtype).reshape(n_packed, Kp)   # free reshape

    # Row tile: as large as possible (amortize per-step cost), but keep >= 2
    # grid steps when the row count allows so v7x can use both TensorCores.
    tm_eff = max(sub, min(_round_up(tm, sub), n_packed))
    if n_packed >= 2 * sub:
        tm_eff = min(tm_eff, _round_up(pl.cdiv(n_packed, 2), sub))
    grid = (pl.cdiv(n_packed, tm_eff),)          # ragged last block -> masked store

    in_bytes = jnp.dtype(compute_dtype).itemsize
    out_bytes = out_dtype.itemsize
    tile_bytes = tm_eff * (Kp * in_bytes + Ep * out_bytes)
    resident_bytes = Kp * Ep * in_bytes + Ep * 4
    vmem_need = 2 * tile_bytes + 2 * resident_bytes
    vmem_limit = int(min(max(2 * vmem_need, 32 << 20), 64 << 20))

    out = pl.pallas_call(
        _proj_kernel,
        out_shape=jax.ShapeDtypeStruct((n_packed, Ep), out_dtype),
        grid_spec=pltpu.PrefetchScalarGridSpec(
            num_scalar_prefetch=0,
            grid=grid,
            in_specs=[
                pl.BlockSpec((tm_eff, Kp), lambda i: (i, 0)),   # packed patch rows
                pl.BlockSpec((Kp, Ep), lambda i: (0, 0)),       # weight (resident)
                pl.BlockSpec((1, Ep), lambda i: (0, 0)),        # bias (resident)
            ],
            out_specs=pl.BlockSpec((tm_eff, Ep), lambda i: (i, 0)),
        ),
        compiler_params=pltpu.CompilerParams(
            dimension_semantics=("parallel",),
            vmem_limit_bytes=vmem_limit,
            # Let XLA fuse the patch-extraction reshape/transpose/cast chain
            # into the kernel's input DMA (avoid an extra HBM pass).
            allow_input_fusion=[True, False, False],
        ),
        cost_estimate=pl.CostEstimate(
            flops=2 * N * K * embed_size,        # useful FLOPs only
            transcendentals=0,
            bytes_accessed=(n_packed * Kp * in_bytes
                            + Kp * Ep * in_bytes
                            + Ep * 4
                            + n_packed * Ep * out_bytes),
        ),
    )(x2d, w_bd, b2d)

    # Free reshape + tail/column slice (padded rows / columns discarded).
    return out.reshape(n_rows, embed_pad)[:N, :embed_size]


# ---------------------------------------------------------------------------
# PatchEmbedding forward
# ---------------------------------------------------------------------------
def extract_patches(x, patch_size):
    """Replicates x.unfold(2,p,p).unfold(3,p,p).contiguous().view(B,nf,np,p*p)."""
    B, nf, H, W = x.shape
    p = patch_size
    gh, gw = H // p, W // p
    x = x.reshape(B, nf, gh, p, gw, p)
    x = jnp.transpose(x, (0, 1, 2, 4, 3, 5))          # (B, nf, gh, gw, p, p)
    return x.reshape(B, nf, gh * gw, p * p)


def patch_embedding_forward(x, params, patch_size, embed_size, num_patches, *,
                            tm=2048, out_dtype=None):
    """Matches PatchEmbedding.forward: returns (B, nf, num_patches, embed_size).

    The PyTorch permutes before/after the Linear only reorder rows of a rowwise
    op; flattening in (B, nf, num_patches) order and reshaping back is
    semantically identical to the reference.
    """
    B, nf, H, W = x.shape
    out_dtype = out_dtype if out_dtype is not None else x.dtype
    w_bd, b2d = params["w_bd"], params["b2d"]
    # Cast *before* patch extraction: if XLA materializes the patch intermediate
    # despite allow_input_fusion, it is half-size in bf16.
    # TODO(synk): verify via HLO/xprof that the reshape/transpose chain fuses
    # into the Pallas input DMA; otherwise move patch rearrangement in-kernel.
    x = x.astype(w_bd.dtype)
    patches = extract_patches(x, patch_size)          # (B, nf, num_patches, p*p)
    rows = patches.reshape(B * nf * num_patches, patch_size * patch_size)
    out = linear_projection(rows, w_bd, b2d, embed_size, tm=tm,
                            out_dtype=out_dtype)
    return out.reshape(B, nf, num_patches, embed_size)


def init_params(key, patch_size, embed_size, *, compute_dtype=jnp.bfloat16):
    """nn.Linear(patch_size*patch_size, embed_size)-shaped params plus the
    precomputed block-diagonal weight / tiled bias for the kernel.  The weight
    is stored transposed, (in_features, embed_size)."""
    in_features = patch_size * patch_size
    kw, kb = jax.random.split(key)
    bound = 1.0 / jnp.sqrt(in_features)
    w = jax.random.uniform(kw, (in_features, embed_size), jnp.float32, -bound, bound)
    b = jax.random.uniform(kb, (embed_size,), jnp.float32, -bound, bound)
    params = {"w": w, "b": b}
    params.update(make_projection_params(w, b, compute_dtype=compute_dtype))
    return params


if __name__ == "__main__":
    # Small shapes consistent with the module's forward.
    batch, nf, H, W = 2, 4, 16, 16
    patch_size = 8
    embed_size = 32
    num_patches = (H // patch_size) * (W // patch_size)   # 4

    key = jax.random.PRNGKey(0)
    kx, kp = jax.random.split(key)
    x = jax.random.normal(kx, (batch, nf, H, W), jnp.float32)
    params = init_params(kp, patch_size, embed_size)       # bf16 compute path

    fwd = jax.jit(
        functools.partial(
            patch_embedding_forward,
            patch_size=patch_size,
            embed_size=embed_size,
            num_patches=num_patches,
        )
    )
    out = fwd(x, params)
    jax.block_until_ready(out)

    # Reference: same math in plain JAX / f32.  The kernel casts activations
    # and weight to bf16 (accumulation stays f32), so use a bf16-level tolerance.
    patches = extract_patches(x, patch_size)
    ref = patches.reshape(-1, patch_size * patch_size) @ params["w"] + params["b"]
    ref = ref.reshape(batch, nf, num_patches, embed_size)

    assert out.shape == (batch, nf, num_patches, embed_size)
    assert out.dtype == x.dtype
    assert jnp.allclose(out.astype(jnp.float32), ref, atol=3e-2, rtol=3e-2)
    print("KERNEL_OK")
</pallas_src>

<mosaic_0001>
module attributes {stable_mosaic.version = 11 : i64} {
  func.func @_proj_kernel(%arg0: i32, %arg1: memref<16x256xbf16, #tpu.memory_space<vmem>>, %arg2: memref<256x128xbf16, #tpu.memory_space<vmem>>, %arg3: memref<1x128xf32, #tpu.memory_space<vmem>>, %arg4: memref<16x128xf32, #tpu.memory_space<vmem>>) attributes {dimension_semantics = [#tpu.dimension_semantics<parallel>], iteration_bounds = array<i64: 1>, scalar_prefetch = 0 : i64, scratch_operands = 0 : i64, tpu.core_type = #tpu.core_type<tc>, window_params = [{transform_indices = @transform_0, window_bounds = array<i64: 16, 256>}, {pipeline_mode = #tpu.pipeline_mode<synchronous>, transform_indices = @transform_1, window_bounds = array<i64: 256, 128>}, {pipeline_mode = #tpu.pipeline_mode<synchronous>, transform_indices = @transform_2, window_bounds = array<i64: 1, 128>}, {transform_indices = @transform_3, window_bounds = array<i64: 16, 128>}]} {
    %c0 = arith.constant 0 : index
    %c0_0 = arith.constant 0 : index
    %0 = vector.load %arg1[%c0, %c0_0] : memref<16x256xbf16, #tpu.memory_space<vmem>>, vector<16x256xbf16>
    %c0_1 = arith.constant 0 : index
    %c0_2 = arith.constant 0 : index
    %1 = vector.load %arg2[%c0_1, %c0_2] : memref<256x128xbf16, #tpu.memory_space<vmem>>, vector<256x128xbf16>
    %cst = arith.constant dense<0.000000e+00> : vector<16x128xf32>
    %2 = tpu.matmul %0, %1, %cst {dimension_numbers = #tpu.dot_dimension_numbers<[1], [0], [0], [1], [0, 0, 1, 1], [], []>} : vector<16x256xbf16>, vector<256x128xbf16>, vector<16x128xf32> -> vector<16x128xf32>
    %c0_3 = arith.constant 0 : index
    %c0_4 = arith.constant 0 : index
    %3 = vector.load %arg3[%c0_3, %c0_4] : memref<1x128xf32, #tpu.memory_space<vmem>>, vector<1x128xf32>
    %4 = vector.broadcast %3 : vector<1x128xf32> to vector<16x128xf32>
    %5 = arith.addf %2, %4 : vector<16x128xf32>
    %c0_5 = arith.constant 0 : index
    %c0_6 = arith.constant 0 : index
    %6 = vector.load %arg4[%c0_5, %c0_6] : memref<16x128xf32, #tpu.memory_space<vmem>>, vector<16x128xf32>
    tpu.vector_store %arg4[%c0_5, %c0_6], %5 {strides = array<i32>} : memref<16x128xf32, #tpu.memory_space<vmem>>, vector<16x128xf32>,
    return
  }
  func.func @transform_0(%arg0: i32) -> (i32, i32) {
    %c0_i32 = arith.constant 0 : i32
    %c0_i32_0 = arith.constant 0 : i32
    return %arg0, %c0_i32 : i32, i32
  }
  func.func @transform_1(%arg0: i32) -> (i32, i32) {
    %c0_i32 = arith.constant 0 : i32
    %c0_i32_0 = arith.constant 0 : i32
    %c0_i32_1 = arith.constant 0 : i32
    return %c0_i32, %c0_i32_0 : i32, i32
  }
  func.func @transform_2(%arg0: i32) -> (i32, i32) {
    %c0_i32 = arith.constant 0 : i32
    %c0_i32_0 = arith.constant 0 : i32
    %c0_i32_1 = arith.constant 0 : i32
    return %c0_i32, %c0_i32_0 : i32, i32
  }
  func.func @transform_3(%arg0: i32) -> (i32, i32) {
    %c0_i32 = arith.constant 0 : i32
    %c0_i32_0 = arith.constant 0 : i32
    return %arg0, %c0_i32 : i32, i32
  }
}

</mosaic_0001>

<bundles_post_ra>
// kernel: patch_embedding_forward.1
= control target key start
LH: loop header
LB: loop body
LE: loop exit
PB: predicated region body
PF: predicated region fallthrough
CT: control target
= control target key end

     0   :  { %s352_s1 = inlined_call_operand.vmem [shape: bf16[256,128], index: 1, kind: input, shape index: {}]   ;;  %s353_s0 = inlined_call_operand.vmem [shape: bf16[16,256], index: 0, kind: input, shape index: {}]   ;;  %s354_s2 = inlined_call_operand.vmem [shape: f32[1,128], index: 2, kind: input, shape index: {}]   ;;  %s355_s3 = inlined_call_operand.vmem [shape: f32[16,128], index: 3, kind: output, shape index: {}]  }
   0x1   :  { %v250_v0 = vld [vmem:[%s352_s1 + $0x40] sm:$0xff]   ;;  %v252_v2 = vld [vmem:[%s352_s1 + $0x48] sm:$0xff]   ;;  %v254_v4 = vld [vmem:[%s352_s1 + $0x50] sm:$0xff]  }
   0x2   :  { %v251_v1 = vld [vmem:[%s352_s1] sm:$0xff]   ;;  %228 = vmatprep.subr.bf16.mxu0 %v250_v0  ;;  %v253_v3 = vld [vmem:[%s352_s1 + $0x8] sm:$0xff]   ;;  %v255_v5 = vld [vmem:[%s352_s1 + $0x10] sm:$0xff]  }
   0x3   :  { %229 = vmatpush3.bf16.msra.mxu0 %v251_v1  ;;  %v256_v6 = vld [vmem:[%s352_s1 + $0x58] sm:$0xff]   ;;  %v258_v8 = vld [vmem:[%s352_s1 + $0x60] sm:$0xff]   ;;  %v260_v10 = vld [vmem:[%s352_s1 + $0x68] sm:$0xff]  }
   0x4   :  { %230 = vmatprep.subr.bf16.mxu0 %v252_v2  ;;  %v257_v7 = vld [vmem:[%s352_s1 + $0x18] sm:$0xff]   ;;  %v259_v9 = vld [vmem:[%s352_s1 + $0x20] sm:$0xff]   ;;  %v261_v12 = vld [vmem:[%s352_s1 + $0x28] sm:$0xff]  }
   0x5   :  { %v268_v11 = vld [vmem:[%s353_s0 + $0x4] ss:$8 sps:$4 sm:$0xff]   ;;  %v262_v13 = vld [vmem:[%s352_s1 + $0x70] sm:$0xff]   ;;  %v264_v15 = vld [vmem:[%s352_s1 + $0x78] sm:$0xff]  }
   0x6   :  { %194 = vmatprep.mubr.bf16.mxu0 %v268_v11  ;;  %v263_v14 = vld [vmem:[%s352_s1 + $0x30] sm:$0xff]   ;;  %v265_v16 = vld [vmem:[%s352_s1 + $0x38] sm:$0xff]   ;;  %v266_v17 = vld [vmem:[%s353_s0] ss:$8 sps:$4 sm:$0xff]  }
   0x7   :  { %231 = vmatpush3.bf16.msra.mxu0 %v253_v3  ;;  %v209_v19 = vld [vmem:[%s354_s2] ss:$0 sm:$0xff] }
   0x8   :  { %232 = vmatprep.subr.bf16.mxu0 %v254_v4 }
   0xb   :  { %233 = vmatpush3.bf16.msra.mxu0 %v255_v5 }
   0xc   :  { %234 = vmatprep.subr.bf16.mxu0 %v256_v6 }
   0xf   :  { %235 = vmatpush3.bf16.msra.mxu0 %v257_v7 }
  0x10   :  { %236 = vmatprep.subr.bf16.mxu0 %v258_v8 }
  0x13   :  { %237 = vmatpush3.bf16.msra.mxu0 %v259_v9 }
  0x14   :  { %238 = vmatprep.subr.bf16.mxu0 %v260_v10 }
  0x17   :  { %239 = vmatpush3.bf16.msra.mxu0 %v261_v12 }
  0x18   :  { %240 = vmatprep.subr.bf16.mxu0 %v262_v13 }
  0x1b   :  { %241 = vmatpush3.bf16.msra.mxu0 %v263_v14 }
  0x1c   :  { %242 = vmatprep.subr.bf16.mxu0 %v264_v15 }
  0x1f   :  { %243 = vmatpush3.bf16.msra.mxu0 %v265_v16 }
  0x22   :  { %195 = vmatmul.mubr.bf16.vlgmr.msra.gmra.mrb[0].mxu0 %v266_v17 }
  0xf5   :  { %v244_v18 = vpop.f32.mrb[0].mxu0 }
  0xf6   :  { %v245_v20 = vpop.f32.mrb[1].mxu0 }
  0xf7   :  { %v246_v21 = vadd.f32 %v245_v20, %v244_v18  ;;  %v247_v22 = vpop.f32.mrb[2].mxu0 }
  0xf8   :  { %v248_v23 = vpop.f32.mrb[3].mxu0 }
  0xf9   :  { %v197_v24 = vadd.f32 %v246_v21, %v209_v19  ;;  %v249_v25 = vadd.f32 %v248_v23, %v247_v22 }
  0xfb   :  { %203 = vst [vmem:[%s355_s3] sm:$0xff] %v197_v24  ;;  %v200_v26 = vadd.f32 %v249_v25, %v209_v19 }
  0xfd   :  { %204 = vst [vmem:[%s355_s3 + $0x8] sm:$0xff] %v200_v26 }

</bundles_post_ra>
